<compile_context>
chip_gen: v7x
topology: tpu7x:2x2x1
jax: 0.10.0
libtpu: 0.0.40
codegen_flags: <defaults>
</compile_context>

<pallas_src>
import functools

import jax
import jax.numpy as jnp
from jax.experimental import pallas as pl
from jax.experimental.pallas import tpu as pltpu


def _mlp_topk_kernel(x_ref, w1f_ref, b1f_ref, w2f_ref, b2f_ref, out_ref,
                     *, R, H, D_out, topk):
    """All R replicas in one invocation; all weights VMEM-resident."""
    x = x_ref[...]                                              # (B, D_in) f32
    B = x.shape[0]

    # ---- Layer 1, fused across replicas: one wide MXU matmul ----
    # w1f is (D_in, R*H); hidden[:, r*H:(r+1)*H] == relu(x @ W1[r] + b1[r]).
    hidden = jnp.dot(x, w1f_ref[...], preferred_element_type=jnp.float32)
    hidden = jnp.maximum(hidden + b1f_ref[...], 0.0)            # (B, R*H)

    # ---- Layer 2, block-diagonal fusion: one MXU matmul for all replicas ----
    # w2f is block-diagonal (R*H, R*D_out) so
    # logits_all[:, r*D_out:(r+1)*D_out] == hidden_r @ W2[r] + b2[r].
    logits_all = jnp.dot(hidden, w2f_ref[...],
                         preferred_element_type=jnp.float32) + b2f_ref[...]

    # ---- Order-preserving f32 -> int32 keys (elementwise, computed once) ----
    # Positive floats: bit pattern already monotonic; negatives: flip the
    # non-sign bits so ordering is preserved across the whole range.
    bits = pltpu.bitcast(logits_all, jnp.int32)                 # (B, R*D_out)
    key_all = jnp.where(bits < 0, bits ^ jnp.int32(0x7FFFFFFF), bits)

    idx_bits = max(1, (D_out - 1).bit_length())                 # 7 for D_out=128
    lo_mask = jnp.int32((1 << idx_bits) - 1)
    hi_mask = jnp.int32(~((1 << idx_bits) - 1))
    neg_min = jnp.int32(-(2 ** 31))

    col = jax.lax.broadcasted_iota(jnp.int32, (B, D_out), 1)    # hoisted once
    rev_col = jnp.int32(D_out - 1) - col                        # tie-break: low col wins

    # ---- Top-k per replica: ONE int32 max-reduce per (replica, k) step ----
    for r in range(R):
        key_r = key_all[:, r * D_out:(r + 1) * D_out]           # 128-lane-aligned slice
        packed = (key_r & hi_mask) | rev_col                    # key | index in low bits
        for k in range(topk):
            best = jnp.max(packed, axis=-1, keepdims=True)      # (B, 1) single XLU reduce
            idx = jnp.int32(D_out - 1) - (best & lo_mask)       # decode winning column
            # Column stores kept (proven lowering); batching them is a
            # sub-microsecond win at these sizes.
            out_ref[r, :, pl.ds(k, 1)] = idx
            packed = jnp.where(col == idx, neg_min, packed)     # mask out the winner


def prepare_params(w1s, b1s, w2s, b2s):
    """One-time weight repack — do this at parameter-load time, NOT per call.

    w1s (R, D_in, H), b1s (R, H), w2s (R, H, D_out), b2s (R, D_out)
    -> w1f (D_in, R*H), b1f (1, R*H), block-diag w2f (R*H, R*D_out),
       b2f (1, R*D_out).
    """
    R, D_in, H = w1s.shape
    D_out = w2s.shape[-1]
    w1f = jnp.transpose(w1s, (1, 0, 2)).reshape(D_in, R * H)
    b1f = b1s.reshape(1, R * H)
    w2f = jnp.zeros((R * H, R * D_out), dtype=w2s.dtype)
    for r in range(R):
        w2f = w2f.at[r * H:(r + 1) * H, r * D_out:(r + 1) * D_out].set(w2s[r])
    b2f = b2s.reshape(1, R * D_out)
    return dict(w1f=w1f, b1f=b1f, w2f=w2f, b2f=b2f, R=R, H=H, D_out=D_out)


@functools.partial(jax.jit, static_argnames=("R", "H", "D_out", "topk"))
def _fwd(x, w1f, b1f, w2f, b2f, *, R, H, D_out, topk):
    B = x.shape[0]
    kernel = functools.partial(_mlp_topk_kernel, R=R, H=H, D_out=D_out, topk=topk)
    # Single grid step; every operand lives wholesale in VMEM (<0.5 MiB total).
    return pl.pallas_call(
        kernel,
        out_shape=jax.ShapeDtypeStruct((R, B, topk), jnp.int32),
        in_specs=[pl.BlockSpec(memory_space=pltpu.MemorySpace.VMEM)] * 5,
        out_specs=pl.BlockSpec(memory_space=pltpu.MemorySpace.VMEM),
    )(x, w1f, b1f, w2f, b2f)


def mlp_topk(x, params, topk):
    """Forward pass: stacked [R, B, topk] int32 top-k indices (unsorted)."""
    return _fwd(x, params["w1f"], params["b1f"], params["w2f"], params["b2f"],
                R=params["R"], H=params["H"], D_out=params["D_out"], topk=topk)


def _reference_logits(x, w1s, b1s, w2s, b2s):
    """Pure-JAX reference logits (same math as the torch module), (R,B,D_out)."""
    hp = jax.lax.Precision.HIGHEST
    h = jnp.maximum(
        jnp.einsum("bd,rdh->rbh", x, w1s, precision=hp) + b1s[:, None, :], 0.0)
    return jnp.einsum("rbh,rho->rbo", h, w2s, precision=hp) + b2s[:, None, :]


if __name__ == "__main__":
    # Small, deterministic problem sizes consistent with the module.
    R, B, D_in, H, D_out, TOPK = 3, 8, 32, 64, 128, 4

    key = jax.random.PRNGKey(0)
    kx, k1, k2, k3, k4 = jax.random.split(key, 5)

    x = jax.random.normal(kx, (B, D_in), dtype=jnp.float32)
    w1s = jax.random.normal(k1, (R, D_in, H), dtype=jnp.float32) * 0.1
    b1s = jax.random.normal(k2, (R, H), dtype=jnp.float32) * 0.1
    w2s = jax.random.normal(k3, (R, H, D_out), dtype=jnp.float32) * 0.1
    b2s = jax.random.normal(k4, (R, D_out), dtype=jnp.float32) * 0.1

    params = prepare_params(w1s, b1s, w2s, b2s)      # one-time, load-time repack
    top_buckets = mlp_topk(x, params, TOPK)
    jax.block_until_ready(top_buckets)

    # Correctness: unsorted top-k -> compare index SETS; near-ties at the k-th
    # boundary may legitimately pick a different (equally valid) set, so fall
    # back to a value-based tolerance check in that case.
    logits_ref = _reference_logits(x, w1s, b1s, w2s, b2s)       # (R, B, D_out)
    _, ref_idx = jax.lax.top_k(logits_ref, TOPK)
    got_sorted = jnp.sort(top_buckets, axis=-1)
    ref_sorted = jnp.sort(ref_idx, axis=-1)
    if not bool(jnp.all(got_sorted == ref_sorted)):
        sel = jnp.take_along_axis(logits_ref, top_buckets, axis=-1)
        kth = jnp.sort(logits_ref, axis=-1)[..., -TOPK]
        uniq = bool(jnp.all(jnp.diff(got_sorted, axis=-1) != 0))
        ok = uniq and bool(jnp.all(sel >= kth[..., None] - 1e-3))
        assert ok, "top-k indices mismatch"

    print("KERNEL_OK")
</pallas_src>

<mosaic_0001>
module attributes {stable_mosaic.version = 11 : i64} {
  func.func @_mlp_topk_kernel(%arg0: memref<8x32xf32, #tpu.memory_space<vmem>>, %arg1: memref<32x192xf32, #tpu.memory_space<vmem>>, %arg2: memref<1x192xf32, #tpu.memory_space<vmem>>, %arg3: memref<192x384xf32, #tpu.memory_space<vmem>>, %arg4: memref<1x384xf32, #tpu.memory_space<vmem>>, %arg5: memref<3x8x4xi32, #tpu.memory_space<vmem>>) attributes {dimension_semantics = [], scalar_prefetch = 0 : i64, scratch_operands = 0 : i64, tpu.core_type = #tpu.core_type<tc>} {
    %c0 = arith.constant 0 : index
    %c0_0 = arith.constant 0 : index
    %0 = vector.load %arg0[%c0, %c0_0] : memref<8x32xf32, #tpu.memory_space<vmem>>, vector<8x32xf32>
    %c0_1 = arith.constant 0 : index
    %c0_2 = arith.constant 0 : index
    %1 = vector.load %arg1[%c0_1, %c0_2] : memref<32x192xf32, #tpu.memory_space<vmem>>, vector<32x192xf32>
    %cst = arith.constant dense<0.000000e+00> : vector<8x192xf32>
    %2 = tpu.matmul %0, %1, %cst {dimension_numbers = #tpu.dot_dimension_numbers<[1], [0], [0], [1], [0, 0, 1, 1], [], []>} : vector<8x32xf32>, vector<32x192xf32>, vector<8x192xf32> -> vector<8x192xf32>
    %c0_3 = arith.constant 0 : index
    %c0_4 = arith.constant 0 : index
    %3 = vector.load %arg2[%c0_3, %c0_4] : memref<1x192xf32, #tpu.memory_space<vmem>>, vector<1x192xf32>
    %4 = vector.broadcast %3 : vector<1x192xf32> to vector<8x192xf32>
    %5 = arith.addf %2, %4 : vector<8x192xf32>
    %cst_5 = arith.constant 0.000000e+00 : f32
    %6 = vector.broadcast %cst_5 : f32 to vector<8x192xf32>
    %7 = arith.maximumf %5, %6 : vector<8x192xf32>
    %c0_6 = arith.constant 0 : index
    %c0_7 = arith.constant 0 : index
    %8 = vector.load %arg3[%c0_6, %c0_7] : memref<192x384xf32, #tpu.memory_space<vmem>>, vector<192x384xf32>
    %cst_8 = arith.constant dense<0.000000e+00> : vector<8x384xf32>
    %9 = tpu.matmul %7, %8, %cst_8 {dimension_numbers = #tpu.dot_dimension_numbers<[1], [0], [0], [1], [0, 0, 1, 1], [], []>} : vector<8x192xf32>, vector<192x384xf32>, vector<8x384xf32> -> vector<8x384xf32>
    %c0_9 = arith.constant 0 : index
    %c0_10 = arith.constant 0 : index
    %10 = vector.load %arg4[%c0_9, %c0_10] : memref<1x384xf32, #tpu.memory_space<vmem>>, vector<1x384xf32>
    %11 = vector.broadcast %10 : vector<1x384xf32> to vector<8x384xf32>
    %12 = arith.addf %9, %11 : vector<8x384xf32>
    %13 = tpu.bitcast %12 : vector<8x384xf32> -> vector<8x384xi32>
    %c0_i32 = arith.constant 0 : i32
    %14 = vector.broadcast %c0_i32 : i32 to vector<8x384xi32>
    %15 = arith.cmpi slt, %13, %14 : vector<8x384xi32>
    %c2147483647_i32 = arith.constant 2147483647 : i32
    %16 = vector.broadcast %c2147483647_i32 : i32 to vector<8x384xi32>
    %17 = arith.xori %13, %16 : vector<8x384xi32>
    %18 = arith.select %15, %17, %13 : vector<8x384xi1>, vector<8x384xi32>
    %19 = tpu.iota {dimensions = array<i32: 1>} : vector<8x128xi32>
    %c127_i32 = arith.constant 127 : i32
    %20 = vector.broadcast %c127_i32 : i32 to vector<8x128xi32>
    %21 = arith.subi %20, %19 : vector<8x128xi32>
    %22 = vector.extract_strided_slice %18 {offsets = [0, 0], sizes = [8, 128], strides = [1, 1]} : vector<8x384xi32> to vector<8x128xi32>
    %c-128_i32 = arith.constant -128 : i32
    %23 = vector.broadcast %c-128_i32 : i32 to vector<8x128xi32>
    %24 = arith.andi %22, %23 : vector<8x128xi32>
    %25 = arith.ori %24, %21 : vector<8x128xi32>
    %cst_11 = arith.constant dense<-2147483648> : vector<8xi32>
    %26 = vector.multi_reduction <maxsi>, %25, %cst_11 [1] : vector<8x128xi32> to vector<8xi32>
    %27 = vector.shape_cast %26 : vector<8xi32> to vector<8x1xi32>
    %c127_i32_12 = arith.constant 127 : i32
    %28 = vector.broadcast %c127_i32_12 : i32 to vector<8x1xi32>
    %29 = arith.andi %27, %28 : vector<8x1xi32>
    %c127_i32_13 = arith.constant 127 : i32
    %30 = vector.broadcast %c127_i32_13 : i32 to vector<8x1xi32>
    %31 = arith.subi %30, %29 : vector<8x1xi32>
    %c0_14 = arith.constant 0 : index
    %c0_15 = arith.constant 0 : index
    %c0_16 = arith.constant 0 : index
    %32 = vector.load %arg5[%c0_14, %c0_15, %c0_16] : memref<3x8x4xi32, #tpu.memory_space<vmem>>, vector<1x8x1xi32>
    %33 = vector.shape_cast %32 : vector<1x8x1xi32> to vector<8x1xi32>
    %34 = vector.shape_cast %31 : vector<8x1xi32> to vector<1x8x1xi32>
    tpu.vector_store %arg5[%c0_14, %c0_15, %c0_16], %34 {strides = array<i32>} : memref<3x8x4xi32, #tpu.memory_space<vmem>>, vector<1x8x1xi32>,
    %35 = vector.broadcast %31 : vector<8x1xi32> to vector<8x128xi32>
    %36 = arith.cmpi eq, %19, %35 : vector<8x128xi32>
    %c-2147483648_i32 = arith.constant -2147483648 : i32
    %37 = vector.broadcast %c-2147483648_i32 : i32 to vector<8x128xi32>
    %38 = arith.select %36, %37, %25 : vector<8x128xi1>, vector<8x128xi32>
    %cst_17 = arith.constant dense<-2147483648> : vector<8xi32>
    %39 = vector.multi_reduction <maxsi>, %38, %cst_17 [1] : vector<8x128xi32> to vector<8xi32>
    %40 = vector.shape_cast %39 : vector<8xi32> to vector<8x1xi32>
    %c127_i32_18 = arith.constant 127 : i32
    %41 = vector.broadcast %c127_i32_18 : i32 to vector<8x1xi32>
    %42 = arith.andi %40, %41 : vector<8x1xi32>
    %c127_i32_19 = arith.constant 127 : i32
    %43 = vector.broadcast %c127_i32_19 : i32 to vector<8x1xi32>
    %44 = arith.subi %43, %42 : vector<8x1xi32>
    %c0_20 = arith.constant 0 : index
    %c0_21 = arith.constant 0 : index
    %c1 = arith.constant 1 : index
    %45 = vector.load %arg5[%c0_20, %c0_21, %c1] : memref<3x8x4xi32, #tpu.memory_space<vmem>>, vector<1x8x1xi32>
    %46 = vector.shape_cast %45 : vector<1x8x1xi32> to vector<8x1xi32>
    %47 = vector.shape_cast %44 : vector<8x1xi32> to vector<1x8x1xi32>
    tpu.vector_store %arg5[%c0_20, %c0_21, %c1], %47 {strides = array<i32>} : memref<3x8x4xi32, #tpu.memory_space<vmem>>, vector<1x8x1xi32>,
    %48 = vector.broadcast %44 : vector<8x1xi32> to vector<8x128xi32>
    %49 = arith.cmpi eq, %19, %48 : vector<8x128xi32>
    %c-2147483648_i32_22 = arith.constant -2147483648 : i32
    %50 = vector.broadcast %c-2147483648_i32_22 : i32 to vector<8x128xi32>
    %51 = arith.select %49, %50, %38 : vector<8x128xi1>, vector<8x128xi32>
    %cst_23 = arith.constant dense<-2147483648> : vector<8xi32>
    %52 = vector.multi_reduction <maxsi>, %51, %cst_23 [1] : vector<8x128xi32> to vector<8xi32>
    %53 = vector.shape_cast %52 : vector<8xi32> to vector<8x1xi32>
    %c127_i32_24 = arith.constant 127 : i32
    %54 = vector.broadcast %c127_i32_24 : i32 to vector<8x1xi32>
    %55 = arith.andi %53, %54 : vector<8x1xi32>
    %c127_i32_25 = arith.constant 127 : i32
    %56 = vector.broadcast %c127_i32_25 : i32 to vector<8x1xi32>
    %57 = arith.subi %56, %55 : vector<8x1xi32>
    %c0_26 = arith.constant 0 : index
    %c0_27 = arith.constant 0 : index
    %c2 = arith.constant 2 : index
    %58 = vector.load %arg5[%c0_26, %c0_27, %c2] : memref<3x8x4xi32, #tpu.memory_space<vmem>>, vector<1x8x1xi32>
    %59 = vector.shape_cast %58 : vector<1x8x1xi32> to vector<8x1xi32>
    %60 = vector.shape_cast %57 : vector<8x1xi32> to vector<1x8x1xi32>
    tpu.vector_store %arg5[%c0_26, %c0_27, %c2], %60 {strides = array<i32>} : memref<3x8x4xi32, #tpu.memory_space<vmem>>, vector<1x8x1xi32>,
    %61 = vector.broadcast %57 : vector<8x1xi32> to vector<8x128xi32>
    %62 = arith.cmpi eq, %19, %61 : vector<8x128xi32>
    %c-2147483648_i32_28 = arith.constant -2147483648 : i32
    %63 = vector.broadcast %c-2147483648_i32_28 : i32 to vector<8x128xi32>
    %64 = arith.select %62, %63, %51 : vector<8x128xi1>, vector<8x128xi32>
    %cst_29 = arith.constant dense<-2147483648> : vector<8xi32>
    %65 = vector.multi_reduction <maxsi>, %64, %cst_29 [1] : vector<8x128xi32> to vector<8xi32>
    %66 = vector.shape_cast %65 : vector<8xi32> to vector<8x1xi32>
    %c127_i32_30 = arith.constant 127 : i32
    %67 = vector.broadcast %c127_i32_30 : i32 to vector<8x1xi32>
    %68 = arith.andi %66, %67 : vector<8x1xi32>
    %c127_i32_31 = arith.constant 127 : i32
    %69 = vector.broadcast %c127_i32_31 : i32 to vector<8x1xi32>
    %70 = arith.subi %69, %68 : vector<8x1xi32>
    %c0_32 = arith.constant 0 : index
    %c0_33 = arith.constant 0 : index
    %c3 = arith.constant 3 : index
    %71 = vector.load %arg5[%c0_32, %c0_33, %c3] : memref<3x8x4xi32, #tpu.memory_space<vmem>>, vector<1x8x1xi32>
    %72 = vector.shape_cast %71 : vector<1x8x1xi32> to vector<8x1xi32>
    %73 = vector.shape_cast %70 : vector<8x1xi32> to vector<1x8x1xi32>
    tpu.vector_store %arg5[%c0_32, %c0_33, %c3], %73 {strides = array<i32>} : memref<3x8x4xi32, #tpu.memory_space<vmem>>, vector<1x8x1xi32>,
    %74 = vector.extract_strided_slice %18 {offsets = [0, 128], sizes = [8, 128], strides = [1, 1]} : vector<8x384xi32> to vector<8x128xi32>
    %c-128_i32_34 = arith.constant -128 : i32
    %75 = vector.broadcast %c-128_i32_34 : i32 to vector<8x128xi32>
    %76 = arith.andi %74, %75 : vector<8x128xi32>
    %77 = arith.ori %76, %21 : vector<8x128xi32>
    %cst_35 = arith.constant dense<-2147483648> : vector<8xi32>
    %78 = vector.multi_reduction <maxsi>, %77, %cst_35 [1] : vector<8x128xi32> to vector<8xi32>
    %79 = vector.shape_cast %78 : vector<8xi32> to vector<8x1xi32>
    %c127_i32_36 = arith.constant 127 : i32
    %80 = vector.broadcast %c127_i32_36 : i32 to vector<8x1xi32>
    %81 = arith.andi %79, %80 : vector<8x1xi32>
    %c127_i32_37 = arith.constant 127 : i32
    %82 = vector.broadcast %c127_i32_37 : i32 to vector<8x1xi32>
    %83 = arith.subi %82, %81 : vector<8x1xi32>
    %c1_38 = arith.constant 1 : index
    %c0_39 = arith.constant 0 : index
    %c0_40 = arith.constant 0 : index
    %84 = vector.load %arg5[%c1_38, %c0_39, %c0_40] : memref<3x8x4xi32, #tpu.memory_space<vmem>>, vector<1x8x1xi32>
    %85 = vector.shape_cast %84 : vector<1x8x1xi32> to vector<8x1xi32>
    %86 = vector.shape_cast %83 : vector<8x1xi32> to vector<1x8x1xi32>
    tpu.vector_store %arg5[%c1_38, %c0_39, %c0_40], %86 {strides = array<i32>} : memref<3x8x4xi32, #tpu.memory_space<vmem>>, vector<1x8x1xi32>,
    %87 = vector.broadcast %83 : vector<8x1xi32> to vector<8x128xi32>
    %88 = arith.cmpi eq, %19, %87 : vector<8x128xi32>
    %c-2147483648_i32_41 = arith.constant -2147483648 : i32
    %89 = vector.broadcast %c-2147483648_i32_41 : i32 to vector<8x128xi32>
    %90 = arith.select %88, %89, %77 : vector<8x128xi1>, vector<8x128xi32>
    %cst_42 = arith.constant dense<-2147483648> : vector<8xi32>
    %91 = vector.multi_reduction <maxsi>, %90, %cst_42 [1] : vector<8x128xi32> to vector<8xi32>
    %92 = vector.shape_cast %91 : vector<8xi32> to vector<8x1xi32>
    %c127_i32_43 = arith.constant 127 : i32
    %93 = vector.broadcast %c127_i32_43 : i32 to vector<8x1xi32>
    %94 = arith.andi %92, %93 : vector<8x1xi32>
    %c127_i32_44 = arith.constant 127 : i32
    %95 = vector.broadcast %c127_i32_44 : i32 to vector<8x1xi32>
    %96 = arith.subi %95, %94 : vector<8x1xi32>
    %c1_45 = arith.constant 1 : index
    %c0_46 = arith.constant 0 : index
    %c1_47 = arith.constant 1 : index
    %97 = vector.load %arg5[%c1_45, %c0_46, %c1_47] : memref<3x8x4xi32, #tpu.memory_space<vmem>>, vector<1x8x1xi32>
    %98 = vector.shape_cast %97 : vector<1x8x1xi32> to vector<8x1xi32>
    %99 = vector.shape_cast %96 : vector<8x1xi32> to vector<1x8x1xi32>
    tpu.vector_store %arg5[%c1_45, %c0_46, %c1_47], %99 {strides = array<i32>} : memref<3x8x4xi32, #tpu.memory_space<vmem>>, vector<1x8x1xi32>,
    %100 = vector.broadcast %96 : vector<8x1xi32> to vector<8x128xi32>
    %101 = arith.cmpi eq, %19, %100 : vector<8x128xi32>
    %c-2147483648_i32_48 = arith.constant -2147483648 : i32
    %102 = vector.broadcast %c-2147483648_i32_48 : i32 to vector<8x128xi32>
    %103 = arith.select %101, %102, %90 : vector<8x128xi1>, vector<8x128xi32>
    %cst_49 = arith.constant dense<-2147483648> : vector<8xi32>
    %104 = vector.multi_reduction <maxsi>, %103, %cst_49 [1] : vector<8x128xi32> to vector<8xi32>
    %105 = vector.shape_cast %104 : vector<8xi32> to vector<8x1xi32>
    %c127_i32_50 = arith.constant 127 : i32
    %106 = vector.broadcast %c127_i32_50 : i32 to vector<8x1xi32>
    %107 = arith.andi %105, %106 : vector<8x1xi32>
    %c127_i32_51 = arith.constant 127 : i32
    %108 = vector.broadcast %c127_i32_51 : i32 to vector<8x1xi32>
    %109 = arith.subi %108, %107 : vector<8x1xi32>
    %c1_52 = arith.constant 1 : index
    %c0_53 = arith.constant 0 : index
    %c2_54 = arith.constant 2 : index
    %110 = vector.load %arg5[%c1_52, %c0_53, %c2_54] : memref<3x8x4xi32, #tpu.memory_space<vmem>>, vector<1x8x1xi32>
    %111 = vector.shape_cast %110 : vector<1x8x1xi32> to vector<8x1xi32>
    %112 = vector.shape_cast %109 : vector<8x1xi32> to vector<1x8x1xi32>
    tpu.vector_store %arg5[%c1_52, %c0_53, %c2_54], %112 {strides = array<i32>} : memref<3x8x4xi32, #tpu.memory_space<vmem>>, vector<1x8x1xi32>,
    %113 = vector.broadcast %109 : vector<8x1xi32> to vector<8x128xi32>
    %114 = arith.cmpi eq, %19, %113 : vector<8x128xi32>
    %c-2147483648_i32_55 = arith.constant -2147483648 : i32
    %115 = vector.broadcast %c-2147483648_i32_55 : i32 to vector<8x128xi32>
    %116 = arith.select %114, %115, %103 : vector<8x128xi1>, vector<8x128xi32>
    %cst_56 = arith.constant dense<-2147483648> : vector<8xi32>
    %117 = vector.multi_reduction <maxsi>, %116, %cst_56 [1] : vector<8x128xi32> to vector<8xi32>
    %118 = vector.shape_cast %117 : vector<8xi32> to vector<8x1xi32>
    %c127_i32_57 = arith.constant 127 : i32
    %119 = vector.broadcast %c127_i32_57 : i32 to vector<8x1xi32>
    %120 = arith.andi %118, %119 : vector<8x1xi32>
    %c127_i32_58 = arith.constant 127 : i32
    %121 = vector.broadcast %c127_i32_58 : i32 to vector<8x1xi32>
    %122 = arith.subi %121, %120 : vector<8x1xi32>
    %c1_59 = arith.constant 1 : index
    %c0_60 = arith.constant 0 : index
    %c3_61 = arith.constant 3 : index
    %123 = vector.load %arg5[%c1_59, %c0_60, %c3_61] : memref<3x8x4xi32, #tpu.memory_space<vmem>>, vector<1x8x1xi32>
    %124 = vector.shape_cast %123 : vector<1x8x1xi32> to vector<8x1xi32>
    %125 = vector.shape_cast %122 : vector<8x1xi32> to vector<1x8x1xi32>
    tpu.vector_store %arg5[%c1_59, %c0_60, %c3_61], %125 {strides = array<i32>} : memref<3x8x4xi32, #tpu.memory_space<vmem>>, vector<1x8x1xi32>,
    %126 = vector.extract_strided_slice %18 {offsets = [0, 256], sizes = [8, 128], strides = [1, 1]} : vector<8x384xi32> to vector<8x128xi32>
    %c-128_i32_62 = arith.constant -128 : i32
    %127 = vector.broadcast %c-128_i32_62 : i32 to vector<8x128xi32>
    %128 = arith.andi %126, %127 : vector<8x128xi32>
    %129 = arith.ori %128, %21 : vector<8x128xi32>
    %cst_63 = arith.constant dense<-2147483648> : vector<8xi32>
    %130 = vector.multi_reduction <maxsi>, %129, %cst_63 [1] : vector<8x128xi32> to vector<8xi32>
    %131 = vector.shape_cast %130 : vector<8xi32> to vector<8x1xi32>
    %c127_i32_64 = arith.constant 127 : i32
    %132 = vector.broadcast %c127_i32_64 : i32 to vector<8x1xi32>
    %133 = arith.andi %131, %132 : vector<8x1xi32>
    %c127_i32_65 = arith.constant 127 : i32
    %134 = vector.broadcast %c127_i32_65 : i32 to vector<8x1xi32>
    %135 = arith.subi %134, %133 : vector<8x1xi32>
    %c2_66 = arith.constant 2 : index
    %c0_67 = arith.constant 0 : index
    %c0_68 = arith.constant 0 : index
    %136 = vector.load %arg5[%c2_66, %c0_67, %c0_68] : memref<3x8x4xi32, #tpu.memory_space<vmem>>, vector<1x8x1xi32>
    %137 = vector.shape_cast %136 : vector<1x8x1xi32> to vector<8x1xi32>
    %138 = vector.shape_cast %135 : vector<8x1xi32> to vector<1x8x1xi32>
    tpu.vector_store %arg5[%c2_66, %c0_67, %c0_68], %138 {strides = array<i32>} : memref<3x8x4xi32, #tpu.memory_space<vmem>>, vector<1x8x1xi32>,
    %139 = vector.broadcast %135 : vector<8x1xi32> to vector<8x128xi32>
    %140 = arith.cmpi eq, %19, %139 : vector<8x128xi32>
    %c-2147483648_i32_69 = arith.constant -2147483648 : i32
    %141 = vector.broadcast %c-2147483648_i32_69 : i32 to vector<8x128xi32>
    %142 = arith.select %140, %141, %129 : vector<8x128xi1>, vector<8x128xi32>
    %cst_70 = arith.constant dense<-2147483648> : vector<8xi32>
    %143 = vector.multi_reduction <maxsi>, %142, %cst_70 [1] : vector<8x128xi32> to vector<8xi32>
    %144 = vector.shape_cast %143 : vector<8xi32> to vector<8x1xi32>
    %c127_i32_71 = arith.constant 127 : i32
    %145 = vector.broadcast %c127_i32_71 : i32 to vector<8x1xi32>
    %146 = arith.andi %144, %145 : vector<8x1xi32>
    %c127_i32_72 = arith.constant 127 : i32
    %147 = vector.broadcast %c127_i32_72 : i32 to vector<8x1xi32>
    %148 = arith.subi %147, %146 : vector<8x1xi32>
    %c2_73 = arith.constant 2 : index
    %c0_74 = arith.constant 0 : index
    %c1_75 = arith.constant 1 : index
    %149 = vector.load %arg5[%c2_73, %c0_74, %c1_75] : memref<3x8x4xi32, #tpu.memory_space<vmem>>, vector<1x8x1xi32>
    %150 = vector.shape_cast %149 : vector<1x8x1xi32> to vector<8x1xi32>
    %151 = vector.shape_cast %148 : vector<8x1xi32> to vector<1x8x1xi32>
    tpu.vector_store %arg5[%c2_73, %c0_74, %c1_75], %151 {strides = array<i32>} : memref<3x8x4xi32, #tpu.memory_space<vmem>>, vector<1x8x1xi32>,
    %152 = vector.broadcast %148 : vector<8x1xi32> to vector<8x128xi32>
    %153 = arith.cmpi eq, %19, %152 : vector<8x128xi32>
    %c-2147483648_i32_76 = arith.constant -2147483648 : i32
    %154 = vector.broadcast %c-2147483648_i32_76 : i32 to vector<8x128xi32>
    %155 = arith.select %153, %154, %142 : vector<8x128xi1>, vector<8x128xi32>
    %cst_77 = arith.constant dense<-2147483648> : vector<8xi32>
    %156 = vector.multi_reduction <maxsi>, %155, %cst_77 [1] : vector<8x128xi32> to vector<8xi32>
    %157 = vector.shape_cast %156 : vector<8xi32> to vector<8x1xi32>
    %c127_i32_78 = arith.constant 127 : i32
    %158 = vector.broadcast %c127_i32_78 : i32 to vector<8x1xi32>
    %159 = arith.andi %157, %158 : vector<8x1xi32>
    %c127_i32_79 = arith.constant 127 : i32
    %160 = vector.broadcast %c127_i32_79 : i32 to vector<8x1xi32>
    %161 = arith.subi %160, %159 : vector<8x1xi32>
    %c2_80 = arith.constant 2 : index
    %c0_81 = arith.constant 0 : index
    %c2_82 = arith.constant 2 : index
    %162 = vector.load %arg5[%c2_80, %c0_81, %c2_82] : memref<3x8x4xi32, #tpu.memory_space<vmem>>, vector<1x8x1xi32>
    %163 = vector.shape_cast %162 : vector<1x8x1xi32> to vector<8x1xi32>
    %164 = vector.shape_cast %161 : vector<8x1xi32> to vector<1x8x1xi32>
    tpu.vector_store %arg5[%c2_80, %c0_81, %c2_82], %164 {strides = array<i32>} : memref<3x8x4xi32, #tpu.memory_space<vmem>>, vector<1x8x1xi32>,
    %165 = vector.broadcast %161 : vector<8x1xi32> to vector<8x128xi32>
    %166 = arith.cmpi eq, %19, %165 : vector<8x128xi32>
    %c-2147483648_i32_83 = arith.constant -2147483648 : i32
    %167 = vector.broadcast %c-2147483648_i32_83 : i32 to vector<8x128xi32>
    %168 = arith.select %166, %167, %155 : vector<8x128xi1>, vector<8x128xi32>
    %cst_84 = arith.constant dense<-2147483648> : vector<8xi32>
    %169 = vector.multi_reduction <maxsi>, %168, %cst_84 [1] : vector<8x128xi32> to vector<8xi32>
    %170 = vector.shape_cast %169 : vector<8xi32> to vector<8x1xi32>
    %c127_i32_85 = arith.constant 127 : i32
    %171 = vector.broadcast %c127_i32_85 : i32 to vector<8x1xi32>
    %172 = arith.andi %170, %171 : vector<8x1xi32>
    %c127_i32_86 = arith.constant 127 : i32
    %173 = vector.broadcast %c127_i32_86 : i32 to vector<8x1xi32>
    %174 = arith.subi %173, %172 : vector<8x1xi32>
    %c2_87 = arith.constant 2 : index
    %c0_88 = arith.constant 0 : index
    %c3_89 = arith.constant 3 : index
    %175 = vector.load %arg5[%c2_87, %c0_88, %c3_89] : memref<3x8x4xi32, #tpu.memory_space<vmem>>, vector<1x8x1xi32>
    %176 = vector.shape_cast %175 : vector<1x8x1xi32> to vector<8x1xi32>
    %177 = vector.shape_cast %174 : vector<8x1xi32> to vector<1x8x1xi32>
    tpu.vector_store %arg5[%c2_87, %c0_88, %c3_89], %177 {strides = array<i32>} : memref<3x8x4xi32, #tpu.memory_space<vmem>>, vector<1x8x1xi32>,
    return
  }
}

</mosaic_0001>

<bundles_post_ra>
// kernel: _fwd.1
= control target key start
LH: loop header
LB: loop body
LE: loop exit
PB: predicated region body
PF: predicated region fallthrough
CT: control target
= control target key end

     0   :  { %10 = vsyncpa [#allocation3], 0  ;;  %s969_s0 = inlined_call_operand.hbm [shape: f32[8,32], index: 0, kind: input, shape index: {}]   ;;  %s970_s1 = inlined_call_operand.hbm [shape: f32[32,192], index: 1, kind: input, shape index: {}]   ;;  %s971_s2 = inlined_call_operand.vmem [shape: f32[1,192], index: 2, kind: input, shape index: {}]   ;;  %s972_s3 = inlined_call_operand.hbm [shape: f32[192,384], index: 3, kind: input, shape index: {}]   ;;  %s973_s4 = inlined_call_operand.vmem [shape: f32[1,384], index: 4, kind: input, shape index: {}]   ;;  %s974_s5 = inlined_call_operand.vmem [shape: s32[3,8,4], index: 5, kind: output, shape index: {}]  }
   0x1   :  { %11 = vsyncpa [#allocation5], 0  ;;  %s828_s18 = smov [#allocation4]   ;;  %s758_s22 = scalar_lea.hbm %s970_s1, 1024 }
   0x2   :  { %s27_s19 = sshll.u32 %s828_s18, 4  ;;  %p759_p0 = scmp.ne.s32.totalorder %s970_s1, %s758_s22  ;;  %s28_s19 = int_to_ptr.vmem [resolvable:$true] %s27_s19 }
   0x3   :  { %p762_p1 = scmp.lt.u32.totalorder %s758_s22, %s970_s1 }
   0x5   :  { %p764_p2 = pnand %p762_p1, %p759_p0 }
   0x7   :  { %767 = shalt.err (!%p764_p2)
}
   0x8   :  { %s768_s27 = scalar_lea.vmem %s28_s19, 1024  ;;  %p773_p4 = scmp.lt.s32.totalorder %s28_s19, %s28_s19 }
   0x9   :  { %p769_p3 = scmp.ne.s32.totalorder %s28_s19, %s768_s27  ;;  %p774_p5 = scmp.lt.s32.totalorder %s768_s27, %s768_s27 }
   0xb   :  { %p775_p6 = por %p774_p5, %p773_p4 }
   0xd   :  { %p776_p7 = pnand %p775_p6, %p769_p3 }
   0xf   :  { %779 = shalt.err (!%p776_p7)
}
  0x10   :  { %s829_s28 = smov 256   ;;  %s830_s29 = smov 16  }
  0x11   :  { %33 = dma.hbm_to_vmem [thread:$0]  %s970_s1, 1024, %s28_s19, [#allocation5], %s829_s28, %s829_s28, %s830_s29  }
  0x12   :  { %s831_s7 = smov [#allocation2]   ;;  %s832_s9 = smov [#allocation6]  }
  0x13   :  { %s18_s8 = sshll.u32 %s831_s7, 4  ;;  %s41_s10 = sshll.u32 %s832_s9, 4  ;;  %s19_s8 = int_to_ptr.vmem [resolvable:$true] %s18_s8  ;;  %s42_s10 = int_to_ptr.vmem [resolvable:$true] %s41_s10 }
  0x14   :  { %s780_s13 = scalar_lea.hbm %s969_s0, 128 }
  0x15   :  { %p781_p8 = scmp.ne.s32.totalorder %s969_s0, %s780_s13  ;;  %p784_p9 = scmp.lt.u32.totalorder %s780_s13, %s969_s0 }
  0x17   :  { %p786_p10 = pnand %p784_p9, %p781_p8 }
  0x19   :  { %789 = shalt.err (!%p786_p10)
}
  0x1a   :  { %s790_s1 = scalar_lea.vmem %s19_s8, 128  ;;  %p795_p12 = scmp.lt.s32.totalorder %s19_s8, %s19_s8 }
  0x1b   :  { %p791_p11 = scmp.ne.s32.totalorder %s19_s8, %s790_s1  ;;  %p796_p13 = scmp.lt.s32.totalorder %s790_s1, %s790_s1 }
  0x1d   :  { %p797_p0 = por %p796_p13, %p795_p12 }
  0x1f   :  { %p798_p1 = pnand %p797_p0, %p791_p11 }
  0x21   :  { %801 = shalt.err (!%p798_p1)
}
  0x22   :  { %21 = dma.hbm_to_vmem [thread:$0]  %s969_s0, 128, %s19_s8, [#allocation3]  }
  0x23   :  { %s802_s22 = scalar_lea.hbm %s972_s3, 9216 }
  0x24   :  { %p803_p2 = scmp.ne.s32.totalorder %s972_s3, %s802_s22  ;;  %p806_p3 = scmp.lt.u32.totalorder %s802_s22, %s972_s3 }
  0x26   :  { %p808_p4 = pnand %p806_p3, %p803_p2 }
  0x28   :  { %811 = shalt.err (!%p808_p4)
}
  0x29   :  { %s812_s27 = scalar_lea.vmem %s42_s10, 9216  ;;  %p817_p6 = scmp.lt.s32.totalorder %s42_s10, %s42_s10 }
  0x2a   :  { %p813_p5 = scmp.ne.s32.totalorder %s42_s10, %s812_s27  ;;  %p818_p7 = scmp.lt.s32.totalorder %s812_s27, %s812_s27 }
  0x2c   :  { %p819_p8 = por %p818_p7, %p817_p6 }
  0x2e   :  { %p820_p9 = pnand %p819_p8, %p813_p5 }
  0x30   :  { %823 = shalt.err (!%p820_p9)
}
  0x31   :  { %s833_s0 = smov 384   ;;  %s834_s28 = smov 24  }
  0x32   :  { %47 = dma.hbm_to_vmem [thread:$0]  %s972_s3, 9216, %s42_s10, [#allocation5], %s833_s0, %s833_s0, %s834_s28  }
  0x33   :  { %824 = dma.done.wait [#allocation3], 128  }
  0x34   :  { %825 = vsyncadd [#allocation3], 4294967168 }
  0x35   :  { %826 = dma.done.wait [#allocation5], 10240  }
  0x36   :  { %827 = vsyncadd [#allocation5], 4294957056  ;;  %v835_v0 = vmov 0.0   ;;  %v61_v1 = vld [vmem:[#allocation4 + $0x8] sm:$0xff]  ;;  %v63_v2 = vld [vmem:[#allocation4 + $0x18] sm:$0xff]  ;;  %vm80_vm0 = vcmask 261120  }
  0x37   :  { %148 = vmatprep.mubr.f32.mxu0 %v835_v0  ;;  %v60_v3 = vld [vmem:[#allocation4] sm:$0xff]  ;;  %v657_v4 = vpack.c.bf16 %v63_v2, %v61_v1  ;;  %v62_v5 = vld [vmem:[#allocation4 + $0x10] sm:$0xff]  ;;  %v65_v6 = vld [vmem:[#allocation4 + $0x28] sm:$0xff]  ;;  %v836_v35 = vmov 0.0|0.0   ;;  %vm246_vm1 = vcmask 523264   ;;  %vm424_vm8 = vcmask 7168  }
  0x38   :  { %v67_v7 = vld [vmem:[#allocation4 + $0x38] sm:$0xff]  ;;  %v659_v8 = vpack.c.bf16 %v62_v5, %v60_v3  ;;  %v64_v10 = vld [vmem:[#allocation4 + $0x20] sm:$0xff]  ;;  %v66_v11 = vld [vmem:[#allocation4 + $0x30] sm:$0xff]  ;;  %vm444_vm15 = vcmask 15368  }
  0x39   :  { %v661_v9 = vpack.c.bf16 %v67_v7, %v65_v6  ;;  %658 = vmatprep.subr.bf16.mxu0 %v657_v4  ;;  %v158_v12 = vld [vmem:[#allocation6 + $0x8] sm:$0xff]  ;;  %v161_v13 = vld [vmem:[#allocation6 + $0x20] sm:$0xff]  ;;  %v663_v15 = vpack.c.bf16 %v66_v11, %v64_v10  ;;  %v160_v17 = vld [vmem:[#allocation6 + $0x18] sm:$0xff] }
  0x3a   :  { %v157_v14 = vld [vmem:[#allocation6] sm:$0xff]  ;;  %660 = vmatpush1.bf16.msra.mxu0 %v659_v8  ;;  %v665_v16 = vpack.c.bf16 %v161_v13, %v158_v12  ;;  %v159_v18 = vld [vmem:[#allocation6 + $0x10] sm:$0xff]  ;;  %v162_v19 = vld [vmem:[#allocation6 + $0x28] sm:$0xff] }
  0x3b   :  { %662 = vmatprep.subr.bf16.mxu0 %v661_v9  ;;  %v667_v20 = vpack.c.bf16 %v160_v17, %v157_v14  ;;  %v164_v21 = vld [vmem:[#allocation6 + $0x38] sm:$0xff]  ;;  %v167_v22 = vld [vmem:[#allocation6 + $0x50] sm:$0xff]  ;;  %v166_v25 = vld [vmem:[#allocation6 + $0x48] sm:$0xff]  ;;  %v714_v30 = vpack.c.bf16 %v162_v19, %v159_v18 }
  0x3c   :  { %v163_v23 = vld [vmem:[#allocation6 + $0x30] sm:$0xff]  ;;  %666 = vmatprep.subr.bf16.mxu1 %v665_v16  ;;  %v669_v24 = vpack.c.bf16 %v167_v22, %v164_v21  ;;  %v59_v26 = vld [vmem:[#allocation2] sm:$0xff]  ;;  %v170_v28 = vld [vmem:[#allocation6 + $0x68] sm:$0xff] }
  0x3d   :  { %668 = vmatpush1.bf16.msra.mxu1 %v667_v20  ;;  %v671_v27 = vpack.c.bf16 %v166_v25, %v163_v23  ;;  %v173_v29 = vld [vmem:[#allocation6 + $0x80] sm:$0xff]  ;;  %v172_v34 = vld [vmem:[#allocation6 + $0x78] sm:$0xff]  ;;  %v179_v38 = vld [vmem:[#allocation6 + $0xb0] sm:$0xff] }
  0x3e   :  { %664 = vmatpush1.bf16.msra.mxu0 %v663_v15  ;;  %670 = vmatprep.subr.bf16.mxu1 %v669_v24  ;;  %v165_v31 = vld [vmem:[#allocation6 + $0x40] sm:$0xff]  ;;  %v673_v32 = vpack.c.bf16 %v173_v29, %v170_v28  ;;  %v168_v36 = vld [vmem:[#allocation6 + $0x58] sm:$0xff]  ;;  %v171_v41 = vld [vmem:[#allocation6 + $0x70] sm:$0xff] }
  0x3f   :  { %v169_v33 = vld [vmem:[#allocation6 + $0x60] sm:$0xff]  ;;  %713 = vmatprep.subr.bf16.mxu0 %v836_v35  ;;  %v176_v37 = vld [vmem:[#allocation6 + $0x98] sm:$0xff]  ;;  %v717_v40 = vpack.c.bf16 %v168_v36, %v165_v31  ;;  %v175_v43 = vld [vmem:[#allocation6 + $0x90] sm:$0xff] }
  0x40   :  { %v675_v39 = vpack.c.bf16 %v172_v34, %v169_v33  ;;  %v677_v42 = vpack.c.bf16 %v179_v38, %v176_v37  ;;  %v178_v44 = vld [vmem:[#allocation6 + $0xa8] sm:$0xff]  ;;  %v185_v47 = vld [vmem:[#allocation6 + $0xe0] sm:$0xff]  ;;  %v184_v53 = vld [vmem:[#allocation6 + $0xd8] sm:$0xff] }
  0x41   :  { %646 = vmatmul.mubr.msk.f32.vlgmr.msra.gmra.mrb[0].mxu0 %vm80_vm0, %v59_v26  ;;  %672 = vmatpush1.bf16.msra.mxu1 %v671_v27  ;;  %v174_v45 = vld [vmem:[#allocation6 + $0x88] sm:$0xff]  ;;  %v679_v48 = vpack.c.bf16 %v178_v44, %v175_v43  ;;  %v177_v50 = vld [vmem:[#allocation6 + $0xa0] sm:$0xff]  ;;  %v180_v54 = vld [vmem:[#allocation6 + $0xb8] sm:$0xff] }
  0x42   :  { %715 = vmatpush1.bf16.msra.mxu0 %v714_v30  ;;  %674 = vmatprep.subr.bf16.mxu1 %v673_v32  ;;  %v182_v46 = vld [vmem:[#allocation6 + $0xc8] sm:$0xff]  ;;  %v720_v49 = vpack.c.bf16 %v174_v45, %v171_v41  ;;  %v181_v52 = vld [vmem:[#allocation6 + $0xc0] sm:$0xff]  ;;  %v188_v55 = vld [vmem:[#allocation6 + $0xf8] sm:$0xff]  ;;  %v723_v58 = vpack.c.bf16 %v180_v54, %v177_v50 }
  0x43   :  { %716 = vmatprep.subr.bf16.mxu0 %v836_v35  ;;  %v681_v51 = vpack.c.bf16 %v185_v47, %v182_v46  ;;  %v191_v56 = vld [vmem:[#allocation6 + $0x110] sm:$0xff]  ;;  %v683_v57 = vpack.c.bf16 %v184_v53, %v181_v52  ;;  %v190_v62 = vld [vmem:[#allocation6 + $0x108] sm:$0xff]  ;;  %v197_v1 = vld [vmem:[#allocation6 + $0x140] sm:$0xff] }
  0x44   :  { %v183_v59 = vld [vmem:[#allocation6 + $0xd0] sm:$0xff]  ;;  %v685_v60 = vpack.c.bf16 %v191_v56, %v188_v55  ;;  %v186_v63 = vld [vmem:[#allocation6 + $0xe8] sm:$0xff]  ;;  %v189_v4 = vld [vmem:[#allocation6 + $0x100] sm:$0xff] }
  0x45   :  { %676 = vmatpush1.bf16.msra.mxu1 %v675_v39  ;;  %v187_v61 = vld [vmem:[#allocation6 + $0xf0] sm:$0xff]  ;;  %v194_v0 = vld [vmem:[#allocation6 + $0x128] sm:$0xff]  ;;  %v726_v3 = vpack.c.bf16 %v186_v63, %v183_v59  ;;  %v193_v6 = vld [vmem:[#allocation6 + $0x120] sm:$0xff] }
  0x46   :  { %718 = vmatpush1.bf16.msra.mxu0 %v717_v40  ;;  %678 = vmatprep.subr.bf16.mxu1 %v677_v42  ;;  %v687_v2 = vpack.c.bf16 %v190_v62, %v187_v61  ;;  %v689_v5 = vpack.c.bf16 %v197_v1, %v194_v0  ;;  %v196_v7 = vld [vmem:[#allocation6 + $0x138] sm:$0xff]  ;;  %v203_v10 = vld [vmem:[#allocation6 + $0x170] sm:$0xff]  ;;  %v202_v16 = vld [vmem:[#allocation6 + $0x168] sm:$0xff] }
  0x47   :  { %719 = vmatprep.subr.bf16.mxu0 %v836_v35  ;;  %v192_v8 = vld [vmem:[#allocation6 + $0x118] sm:$0xff]  ;;  %v691_v11 = vpack.c.bf16 %v196_v7, %v193_v6  ;;  %v195_v13 = vld [vmem:[#allocation6 + $0x130] sm:$0xff]  ;;  %v198_v17 = vld [vmem:[#allocation6 + $0x148] sm:$0xff] }
  0x48   :  { %v200_v9 = vld [vmem:[#allocation6 + $0x158] sm:$0xff]  ;;  %v729_v12 = vpack.c.bf16 %v192_v8, %v189_v4  ;;  %v199_v15 = vld [vmem:[#allocation6 + $0x150] sm:$0xff]  ;;  %v206_v18 = vld [vmem:[#allocation6 + $0x188] sm:$0xff]  ;;  %v732_v21 = vpack.c.bf16 %v198_v17, %v195_v13 }
  0x49   :  { %680 = vmatpush1.bf16.msra.mxu1 %v679_v48  ;;  %v693_v14 = vpack.c.bf16 %v203_v10, %v200_v9  ;;  %v209_v19 = vld [vmem:[#allocation6 + $0x1a0] sm:$0xff]  ;;  %v695_v20 = vpack.c.bf16 %v202_v16, %v199_v15  ;;  %v208_v25 = vld [vmem:[#allocation6 + $0x198] sm:$0xff]  ;;  %v215_v28 = vld [vmem:[#allocation6 + $0x1d0] sm:$0xff] }
  0x4a   :  { %721 = vmatpush1.bf16.msra.mxu0 %v720_v49  ;;  %682 = vmatprep.subr.bf16.mxu1 %v681_v51  ;;  %v201_v22 = vld [vmem:[#allocation6 + $0x160] sm:$0xff]  ;;  %v697_v23 = vpack.c.bf16 %v209_v19, %v206_v18  ;;  %v204_v26 = vld [vmem:[#allocation6 + $0x178] sm:$0xff]  ;;  %v207_v31 = vld [vmem:[#allocation6 + $0x190] sm:$0xff] }
  0x4b   :  { %722 = vmatprep.subr.bf16.mxu0 %v836_v35  ;;  %v205_v24 = vld [vmem:[#allocation6 + $0x180] sm:$0xff]  ;;  %v212_v27 = vld [vmem:[#allocation6 + $0x1b8] sm:$0xff]  ;;  %v735_v30 = vpack.c.bf16 %v204_v26, %v201_v22  ;;  %v211_v33 = vld [vmem:[#allocation6 + $0x1b0] sm:$0xff] }
  0x4c   :  { %v699_v29 = vpack.c.bf16 %v208_v25, %v205_v24  ;;  %v701_v32 = vpack.c.bf16 %v215_v28, %v212_v27  ;;  %v214_v34 = vld [vmem:[#allocation6 + $0x1c8] sm:$0xff]  ;;  %v221_v38 = vld [vmem:[#allocation6 + $0x200] sm:$0xff]  ;;  %v216_v43 = vld [vmem:[#allocation6 + $0x1d8] sm:$0xff] }
  0x4d   :  { %684 = vmatpush1.bf16.msra.mxu1 %v683_v57  ;;  %v210_v36 = vld [vmem:[#allocation6 + $0x1a8] sm:$0xff]  ;;  %v703_v39 = vpack.c.bf16 %v214_v34, %v211_v33  ;;  %v213_v42 = vld [vmem:[#allocation6 + $0x1c0] sm:$0xff]  ;;  %v220_v46 = vld [vmem:[#allocation6 + $0x1f8] sm:$0xff] }
  0x4e   :  { %724 = vmatpush1.bf16.msra.mxu0 %v723_v58  ;;  %686 = vmatprep.subr.bf16.mxu1 %v685_v60  ;;  %v218_v37 = vld [vmem:[#allocation6 + $0x1e8] sm:$0xff]  ;;  %v738_v40 = vpack.c.bf16 %v210_v36, %v207_v31  ;;  %v741_v44 = vpack.c.bf16 %v216_v43, %v213_v42  ;;  %v217_v45 = vld [vmem:[#allocation6 + $0x1e0] sm:$0xff]  ;;  %v219_v47 = vld [vmem:[#allocation6 + $0x1f0] sm:$0xff]  ;;  %v70_v60 = vlaneseq }
  0x4f   :  { %725 = vmatprep.subr.bf16.mxu0 %v836_v35  ;;  %v705_v41 = vpack.c.bf16 %v221_v38, %v218_v37  ;;  %v707_v48 = vpack.c.bf16 %v220_v46, %v217_v45  ;;  %v222_v49 = vld [vmem:[#allocation6 + $0x208] sm:$0xff]  ;;  %v224_v51 = vld [vmem:[#allocation6 + $0x218] sm:$0xff]  ;;  %v227_v52 = vld [vmem:[#allocation6 + $0x230] sm:$0xff] }
  0x50   :  { %v744_v50 = vpack.c.bf16 %v222_v49, %v219_v47  ;;  %v709_v53 = vpack.c.bf16 %v227_v52, %v224_v51  ;;  %v223_v54 = vld [vmem:[#allocation6 + $0x210] sm:$0xff]  ;;  %v226_v55 = vld [vmem:[#allocation6 + $0x228] sm:$0xff]  ;;  %v225_v56 = vld [vmem:[#allocation6 + $0x220] sm:$0xff]  ;;  %v71_v61 = vshrl.u32 %v70_v60, 7  ;;  %v921_v13 = vand.u32 127, %v70_v60 }
  0x51   :  { %688 = vmatpush1.bf16.msra.mxu1 %v687_v2  ;;  %v711_v57 = vpack.c.bf16 %v226_v55, %v223_v54  ;;  %v228_v58 = vld [vmem:[#allocation6 + $0x238] sm:$0xff] }
  0x52   :  { %727 = vmatpush1.bf16.msra.mxu0 %v726_v3  ;;  %690 = vmatprep.subr.bf16.mxu1 %v689_v5  ;;  %v747_v59 = vpack.c.bf16 %v228_v58, %v225_v56  ;;  %v72_v62 = vsub.s32 0, %v71_v61  ;;  %v68_v63 = vld [vmem:[%s971_s2] sm:$0x3]  ;;  %v76_v0 = vsub.s32 1, %v71_v61  ;;  %v241_v8 = vsub.s32 2, %v71_v61 }
  0x53   :  { %728 = vmatprep.subr.bf16.mxu0 %v836_v35  ;;  %v229_v9 = vld [vmem:[%s973_s4] sm:$0x7]  ;;  %v405_v24 = vsub.s32 127, %v921_v13 }
  0x54   :  { %v73_v1 = vrot.slane %v68_v63, %v72_v62  ;;  %v77_v2 = vrot.slane %v68_v63, %v76_v0  ;;  %v234_v10 = vrot.slane %v229_v9, %v72_v62 }
  0x55   :  { %692 = vmatpush1.bf16.msra.mxu1 %v691_v11  ;;  %v242_v11 = vrot.slane %v229_v9, %v241_v8 }
  0x56   :  { %730 = vmatpush1.bf16.msra.mxu0 %v729_v12  ;;  %694 = vmatprep.subr.bf16.mxu1 %v693_v14  ;;  %v238_v12 = vrot.slane %v229_v9, %v76_v0 }
  0x57   :  { %731 = vmatprep.subr.bf16.mxu0 %v836_v35 }
  0x59   :  { %696 = vmatpush1.bf16.msra.mxu1 %v695_v20 }
  0x5a   :  { %733 = vmatpush1.bf16.msra.mxu0 %v732_v21  ;;  %698 = vmatprep.subr.bf16.mxu1 %v697_v23 }
  0x5b   :  { %734 = vmatprep.subr.bf16.mxu0 %v836_v35 }
  0x5d   :  { %700 = vmatpush1.bf16.msra.mxu1 %v699_v29 }
  0x5e   :  { %736 = vmatpush1.bf16.msra.mxu0 %v735_v30  ;;  %702 = vmatprep.subr.bf16.mxu1 %v701_v32 }
  0x5f   :  { %737 = vmatprep.subr.bf16.mxu0 %v836_v35 }
  0x61   :  { %704 = vmatpush1.bf16.msra.mxu1 %v703_v39 }
  0x62   :  { %739 = vmatpush1.bf16.msra.mxu0 %v738_v40  ;;  %706 = vmatprep.subr.bf16.mxu1 %v705_v41 }
  0x63   :  { %740 = vmatprep.subr.bf16.mxu0 %v836_v35 }
  0x65   :  { %708 = vmatpush1.bf16.msra.mxu1 %v707_v48 }
  0x66   :  { %742 = vmatpush1.bf16.msra.mxu0 %v741_v44  ;;  %710 = vmatprep.subr.bf16.mxu1 %v709_v53 }
  0x67   :  { %743 = vmatprep.subr.bf16.mxu0 %v836_v35 }
  0x69   :  { %712 = vmatpush1.bf16.msra.mxu1 %v711_v57 }
  0x6a   :  { %745 = vmatpush1.bf16.msra.mxu0 %v744_v50 }
  0x6b   :  { %746 = vmatprep.subr.bf16.mxu0 %v836_v35 }
  0x6e   :  { %748 = vmatpush1.bf16.msra.mxu0 %v747_v59 }
 0x114   :  { %v150_v3 = vpop.f32.mrb[0].mxu0 }
 0x115   :  { %v151_v4 = vadd.f32 %v150_v3, %v73_v1  ;;  %v152_v5 = vpop.f32.mrb[1].mxu0 }
 0x116   :  { %v153_v35 = vadd.f32 %v152_v5, %v77_v2 }
 0x117   :  { %v155_v7 = vmax.f32 %v151_v4, 0.0 }
 0x118   :  { %v156_v6 = vmax.f32 %v153_v35, 0.0 }
 0x11a   :  { %647 = vmatprep.mubr.msk.f32.mxu1 %vm246_vm1, %v156_v6  ;;  %648 = vmatprep.mubr.msk.f32.mxu0 %vm246_vm1, %v156_v6 }
 0x11b   :  { %315 = vmatmul.mubr.f32.vlgmr.msra.gmra.mrb[0].mxu1 %v155_v7  ;;  %386 = vmatmul.mubr.f32.vlgmr.msra.gmra.mrb[2].mxu0 %v155_v7 }
 0x1ee   :  { %v316_v14 = vpop.f32.mrb[0].mxu1  ;;  %v387_v15 = vpop.f32.mrb[2].mxu0 }
 0x1ef   :  { %v317_v16 = vadd.f32 %v316_v14, %v234_v10  ;;  %v388_v17 = vadd.f32 %v387_v15, %v242_v11  ;;  %v318_v18 = vpop.f32.mrb[1].mxu1  ;;  %v389_v19 = vpop.f32.mrb[3].mxu0 }
 0x1f0   :  { %v319_v20 = vadd.f32 %v318_v18, %v238_v12 }
 0x1f1   :  { %vm394_vm2 = vcmp.lt.s32.totalorder %v317_v16, 0  ;;  %v397_v21 = vxor.u32 2147483647, %v317_v16  ;;  %vm396_vm3 = vcmp.lt.s32.totalorder %v388_v17, 0  ;;  %v399_v22 = vxor.u32 2147483647, %v388_v17 }
 0x1f2   :  { %vm395_vm4 = vcmp.lt.s32.totalorder %v319_v20, 0  ;;  %v398_v23 = vxor.u32 2147483647, %v319_v20 }
 0x1f3   :  { %v400_v25 = vsel %vm394_vm2, %v397_v21, %v317_v16  ;;  %v402_v26 = vsel %vm396_vm3, %v399_v22, %v388_v17 }
 0x1f4   :  { %v406_v27 = vand.u32 4294967168, %v400_v25  ;;  %v563_v28 = vand.u32 4294967168, %v402_v26  ;;  %v401_v29 = vsel %vm395_vm4, %v398_v23, %v319_v20 }
 0x1f5   :  { %v486_v30 = vand.u32 4294967168, %v401_v29 }
 0x1f6   :  { %v564_v31 = vor.u32 %v563_v28, %v405_v24  ;;  %v407_v32 = vor.u32 %v406_v27, %v405_v24 }
 0x1f7   :  { %v487_v33 = vor.u32 %v486_v30, %v405_v24 }
 0x1f8   :  { %v566_v34 = vshra.s32 %v564_v31, 16  ;;  %v409_v36 = vshra.s32 %v407_v32, 16  ;;  %v408_v41 = vand.u32 65535, %v407_v32  ;;  %v565_v46 = vand.u32 65535, %v564_v31 }
 0x1f9   :  { %v489_v39 = vshra.s32 %v487_v33, 16  ;;  %v488_v45 = vand.u32 65535, %v487_v33 }
 0x1fa   :  { %v568_v37 = vcvt.s32.f32 %v566_v34  ;;  %v411_v38 = vcvt.s32.f32 %v409_v36  ;;  %v410_v44 = vcvt.s32.f32 %v408_v41  ;;  %v567_v50 = vcvt.s32.f32 %v565_v46 }
 0x1fb   :  { %v491_v40 = vcvt.s32.f32 %v489_v39  ;;  %v490_v49 = vcvt.s32.f32 %v488_v45 }
 0x1fc   :  { %569 = vmax.xlane.f32.xlu1 %v568_v37  ;;  %412 = vmax.xlane.f32.xlu0 %v411_v38 }
 0x200   :  { %492 = vmax.xlane.f32.xlu0 %v491_v40 }
 0x289   :  { %v570_v42 = vpop.xlane.xlu1 %569  ;;  %v413_v43 = vpop.xlane.xlu0 %412 }
 0x28a   :  { %vm414_vm5 = vcmp.eq.f32.partialorder %v411_v38, %v413_v43  ;;  %vm571_vm6 = vcmp.eq.f32.partialorder %v568_v37, %v570_v42  ;;  %v419_v53 = vcvt.f32.s32 %v413_v43  ;;  %v576_v54 = vcvt.f32.s32 %v570_v42 }
 0x28b   :  { %v415_v47 = vsel %vm414_vm5, %v410_v44, -inf  ;;  %v572_v52 = vsel %vm571_vm6, %v567_v50, -inf  ;;  %vm464_vm6 = vcmask 23568  }
 0x28c   :  { %416 = vmax.xlane.f32.xlu1 %v415_v47  ;;  %v420_v56 = vshll.u32 %v419_v53, 16  ;;  %v577_v60 = vshll.u32 %v576_v54, 16 }
 0x28d   :  { %v493_v48 = vpop.xlane.xlu0 %492 }
 0x28e   :  { %vm494_vm7 = vcmp.eq.f32.partialorder %v491_v40, %v493_v48  ;;  %v499_v57 = vcvt.f32.s32 %v493_v48 }
 0x28f   :  { %v495_v51 = vsel %vm494_vm7, %v490_v49, -inf }
 0x290   :  { %496 = vmax.xlane.f32.xlu0 %v495_v51  ;;  %573 = vmax.xlane.f32.xlu1 %v572_v52  ;;  %v500_v63 = vshll.u32 %v499_v57, 16 }
 0x319   :  { %v417_v55 = vpop.xlane.xlu1 %416 }
 0x31a   :  { %v418_v58 = vcvt.f32.s32 %v417_v55 }
 0x31c   :  { %v421_v59 = vadd.s32 %v420_v56, %v418_v58 }
 0x31d   :  { %v497_v61 = vpop.xlane.xlu0 %496  ;;  %v574_v62 = vpop.xlane.xlu1 %573 }
 0x31e   :  { %v422_v0 = vand.u32 127, %v421_v59  ;;  %v498_v1 = vcvt.f32.s32 %v497_v61  ;;  %v575_v2 = vcvt.f32.s32 %v574_v62 }
 0x320   :  { %v423_v3 = vsub.s32 127, %v422_v0  ;;  %v501_v4 = vadd.s32 %v500_v63, %v498_v1  ;;  %v578_v5 = vadd.s32 %v577_v60, %v575_v2 }
 0x322   :  { %425 = vst.msk [vmem:[%s974_s5] sm:$0xff] %vm424_vm8, %v423_v3  ;;  %v502_v35 = vand.u32 127, %v501_v4  ;;  %v579_v6 = vand.u32 127, %v578_v5  ;;  %vm426_vm9 = vcmp.eq.s32.totalorder %v921_v13, %v423_v3 }
 0x323   :  { %v427_v7 = vsel %vm426_vm9, 2147483648, %v407_v32 }
 0x324   :  { %v503_v8 = vsub.s32 127, %v502_v35  ;;  %v580_v9 = vsub.s32 127, %v579_v6  ;;  %v429_v10 = vshra.s32 %v427_v7, 16  ;;  %v428_v19 = vand.u32 65535, %v427_v7 }
 0x326   :  { %649 = vst.msk [vmem:[%s974_s5 + $0x8] sm:$0xff] %vm424_vm8, %v503_v8  ;;  %653 = vst.msk [vmem:[%s974_s5 + $0x10] sm:$0xff] %vm424_vm8, %v580_v9  ;;  %v431_v11 = vcvt.s32.f32 %v429_v10  ;;  %vm506_vm10 = vcmp.eq.s32.totalorder %v921_v13, %v503_v8  ;;  %vm583_vm11 = vcmp.eq.s32.totalorder %v921_v13, %v580_v9  ;;  %v430_v21 = vcvt.s32.f32 %v428_v19 }
 0x327   :  { %v507_v12 = vsel %vm506_vm10, 2147483648, %v487_v33  ;;  %v584_v14 = vsel %vm583_vm11, 2147483648, %v564_v31 }
 0x328   :  { %432 = vmax.xlane.f32.xlu0 %v431_v11  ;;  %v509_v15 = vshra.s32 %v507_v12, 16  ;;  %v586_v16 = vshra.s32 %v584_v14, 16  ;;  %v585_v22 = vand.u32 65535, %v584_v14  ;;  %v508_v23 = vand.u32 65535, %v507_v12 }
 0x32a   :  { %v511_v17 = vcvt.s32.f32 %v509_v15  ;;  %v588_v18 = vcvt.s32.f32 %v586_v16  ;;  %v587_v27 = vcvt.s32.f32 %v585_v22  ;;  %v510_v28 = vcvt.s32.f32 %v508_v23 }
 0x32c   :  { %512 = vmax.xlane.f32.xlu1 %v511_v17  ;;  %589 = vmax.xlane.f32.xlu0 %v588_v18 }
 0x3b5   :  { %v433_v20 = vpop.xlane.xlu0 %432 }
 0x3b6   :  { %vm434_vm12 = vcmp.eq.f32.partialorder %v431_v11, %v433_v20  ;;  %v439_v31 = vcvt.f32.s32 %v433_v20 }
 0x3b7   :  { %v435_v24 = vsel %vm434_vm12, %v430_v21, -inf }
 0x3b8   :  { %436 = vmax.xlane.f32.xlu1 %v435_v24  ;;  %v440_v34 = vshll.u32 %v439_v31, 16 }
 0x3b9   :  { %v590_v25 = vpop.xlane.xlu0 %589  ;;  %v513_v26 = vpop.xlane.xlu1 %512 }
 0x3ba   :  { %vm591_vm13 = vcmp.eq.f32.partialorder %v588_v18, %v590_v25  ;;  %vm514_vm14 = vcmp.eq.f32.partialorder %v511_v17, %v513_v26  ;;  %v596_v32 = vcvt.f32.s32 %v590_v25  ;;  %v519_v36 = vcvt.f32.s32 %v513_v26 }
 0x3bb   :  { %v592_v29 = vsel %vm591_vm13, %v587_v27, -inf  ;;  %v515_v30 = vsel %vm514_vm14, %v510_v28, -inf  ;;  %vm484_vm13 = vcmask 31768  }
 0x3bc   :  { %593 = vmax.xlane.f32.xlu1 %v592_v29  ;;  %516 = vmax.xlane.f32.xlu0 %v515_v30  ;;  %v597_v39 = vshll.u32 %v596_v32, 16  ;;  %v520_v42 = vshll.u32 %v519_v36, 16 }
 0x445   :  { %v437_v33 = vpop.xlane.xlu1 %436 }
 0x446   :  { %v438_v37 = vcvt.f32.s32 %v437_v33 }
 0x448   :  { %v441_v38 = vadd.s32 %v440_v34, %v438_v37 }
 0x449   :  { %v517_v40 = vpop.xlane.xlu0 %516  ;;  %v594_v41 = vpop.xlane.xlu1 %593 }
 0x44a   :  { %v442_v43 = vand.u32 127, %v441_v38  ;;  %v518_v44 = vcvt.f32.s32 %v517_v40  ;;  %v595_v45 = vcvt.f32.s32 %v594_v41 }
 0x44c   :  { %v443_v46 = vsub.s32 127, %v442_v43  ;;  %v521_v47 = vadd.s32 %v520_v42, %v518_v44  ;;  %v598_v48 = vadd.s32 %v597_v39, %v595_v45 }
 0x44e   :  { %445 = vst.msk [vmem:[%s974_s5] sm:$0xff] %vm444_vm15, %v443_v46  ;;  %v522_v49 = vand.u32 127, %v521_v47  ;;  %v599_v50 = vand.u32 127, %v598_v48  ;;  %vm446_vm0 = vcmp.eq.s32.totalorder %v921_v13, %v443_v46 }
 0x44f   :  { %v447_v51 = vsel %vm446_vm0, 2147483648, %v427_v7 }
 0x450   :  { %v523_v52 = vsub.s32 127, %v522_v49  ;;  %v600_v53 = vsub.s32 127, %v599_v50  ;;  %v449_v54 = vshra.s32 %v447_v51, 16  ;;  %v448_v62 = vand.u32 65535, %v447_v51 }
 0x452   :  { %650 = vst.msk [vmem:[%s974_s5 + $0x8] sm:$0xff] %vm444_vm15, %v523_v52  ;;  %654 = vst.msk [vmem:[%s974_s5 + $0x10] sm:$0xff] %vm444_vm15, %v600_v53  ;;  %v451_v55 = vcvt.s32.f32 %v449_v54  ;;  %vm525_vm1 = vcmp.eq.s32.totalorder %v921_v13, %v523_v52  ;;  %vm602_vm2 = vcmp.eq.s32.totalorder %v921_v13, %v600_v53  ;;  %v450_v0 = vcvt.s32.f32 %v448_v62 }
 0x453   :  { %v526_v56 = vsel %vm525_vm1, 2147483648, %v507_v12  ;;  %v603_v57 = vsel %vm602_vm2, 2147483648, %v584_v14 }
 0x454   :  { %452 = vmax.xlane.f32.xlu0 %v451_v55  ;;  %v528_v58 = vshra.s32 %v526_v56, 16  ;;  %v605_v59 = vshra.s32 %v603_v57, 16  ;;  %v604_v1 = vand.u32 65535, %v603_v57  ;;  %v527_v2 = vand.u32 65535, %v526_v56 }
 0x456   :  { %v530_v60 = vcvt.s32.f32 %v528_v58  ;;  %v607_v61 = vcvt.s32.f32 %v605_v59  ;;  %v606_v35 = vcvt.s32.f32 %v604_v1  ;;  %v529_v6 = vcvt.s32.f32 %v527_v2 }
 0x458   :  { %531 = vmax.xlane.f32.xlu1 %v530_v60  ;;  %608 = vmax.xlane.f32.xlu0 %v607_v61 }
 0x4e1   :  { %v453_v63 = vpop.xlane.xlu0 %452 }
 0x4e2   :  { %vm454_vm3 = vcmp.eq.f32.partialorder %v451_v55, %v453_v63  ;;  %v459_v9 = vcvt.f32.s32 %v453_v63 }
 0x4e3   :  { %v455_v3 = vsel %vm454_vm3, %v450_v0, -inf }
 0x4e4   :  { %456 = vmax.xlane.f32.xlu1 %v455_v3  ;;  %v460_v12 = vshll.u32 %v459_v9, 16 }
 0x4e5   :  { %v609_v4 = vpop.xlane.xlu0 %608  ;;  %v532_v5 = vpop.xlane.xlu1 %531 }
 0x4e6   :  { %vm610_vm4 = vcmp.eq.f32.partialorder %v607_v61, %v609_v4  ;;  %vm533_vm5 = vcmp.eq.f32.partialorder %v530_v60, %v532_v5  ;;  %v615_v10 = vcvt.f32.s32 %v609_v4  ;;  %v538_v14 = vcvt.f32.s32 %v532_v5 }
 0x4e7   :  { %v611_v7 = vsel %vm610_vm4, %v606_v35, -inf  ;;  %v534_v8 = vsel %vm533_vm5, %v529_v6, -inf }
 0x4e8   :  { %612 = vmax.xlane.f32.xlu1 %v611_v7  ;;  %535 = vmax.xlane.f32.xlu0 %v534_v8  ;;  %v616_v17 = vshll.u32 %v615_v10, 16  ;;  %v539_v20 = vshll.u32 %v538_v14, 16 }
 0x571   :  { %v457_v11 = vpop.xlane.xlu1 %456 }
 0x572   :  { %v458_v15 = vcvt.f32.s32 %v457_v11 }
 0x574   :  { %v461_v16 = vadd.s32 %v460_v12, %v458_v15 }
 0x575   :  { %v536_v18 = vpop.xlane.xlu0 %535  ;;  %v613_v19 = vpop.xlane.xlu1 %612 }
 0x576   :  { %v462_v21 = vand.u32 127, %v461_v16  ;;  %v537_v22 = vcvt.f32.s32 %v536_v18  ;;  %v614_v23 = vcvt.f32.s32 %v613_v19 }
 0x578   :  { %v463_v24 = vsub.s32 127, %v462_v21  ;;  %v540_v25 = vadd.s32 %v539_v20, %v537_v22  ;;  %v617_v26 = vadd.s32 %v616_v17, %v614_v23 }
 0x57a   :  { %465 = vst.msk [vmem:[%s974_s5] sm:$0xff] %vm464_vm6, %v463_v24  ;;  %v541_v27 = vand.u32 127, %v540_v25  ;;  %v618_v28 = vand.u32 127, %v617_v26  ;;  %vm466_vm7 = vcmp.eq.s32.totalorder %v921_v13, %v463_v24 }
 0x57b   :  { %v467_v29 = vsel %vm466_vm7, 2147483648, %v447_v51 }
 0x57c   :  { %v542_v30 = vsub.s32 127, %v541_v27  ;;  %v619_v31 = vsub.s32 127, %v618_v28  ;;  %v469_v32 = vshra.s32 %v467_v29, 16  ;;  %v468_v41 = vand.u32 65535, %v467_v29 }
 0x57e   :  { %651 = vst.msk [vmem:[%s974_s5 + $0x8] sm:$0xff] %vm464_vm6, %v542_v30  ;;  %655 = vst.msk [vmem:[%s974_s5 + $0x10] sm:$0xff] %vm464_vm6, %v619_v31  ;;  %v471_v33 = vcvt.s32.f32 %v469_v32  ;;  %vm544_vm8 = vcmp.eq.s32.totalorder %v921_v13, %v542_v30  ;;  %vm621_vm9 = vcmp.eq.s32.totalorder %v921_v13, %v619_v31  ;;  %v470_v43 = vcvt.s32.f32 %v468_v41 }
 0x57f   :  { %v545_v34 = vsel %vm544_vm8, 2147483648, %v526_v56  ;;  %v622_v36 = vsel %vm621_vm9, 2147483648, %v603_v57 }
 0x580   :  { %472 = vmax.xlane.f32.xlu0 %v471_v33  ;;  %v547_v37 = vshra.s32 %v545_v34, 16  ;;  %v624_v38 = vshra.s32 %v622_v36, 16  ;;  %v623_v44 = vand.u32 65535, %v622_v36  ;;  %v546_v45 = vand.u32 65535, %v545_v34 }
 0x582   :  { %v549_v39 = vcvt.s32.f32 %v547_v37  ;;  %v626_v40 = vcvt.s32.f32 %v624_v38  ;;  %v625_v13 = vcvt.s32.f32 %v623_v44  ;;  %v548_v49 = vcvt.s32.f32 %v546_v45 }
 0x584   :  { %550 = vmax.xlane.f32.xlu1 %v549_v39  ;;  %627 = vmax.xlane.f32.xlu0 %v626_v40 }
 0x60d   :  { %v473_v42 = vpop.xlane.xlu0 %472 }
 0x60e   :  { %vm474_vm10 = vcmp.eq.f32.partialorder %v471_v33, %v473_v42  ;;  %v479_v52 = vcvt.f32.s32 %v473_v42 }
 0x60f   :  { %v475_v46 = vsel %vm474_vm10, %v470_v43, -inf }
 0x610   :  { %476 = vmax.xlane.f32.xlu1 %v475_v46  ;;  %v480_v55 = vshll.u32 %v479_v52, 16 }
 0x611   :  { %v628_v47 = vpop.xlane.xlu0 %627  ;;  %v551_v48 = vpop.xlane.xlu1 %550 }
 0x612   :  { %vm629_vm11 = vcmp.eq.f32.partialorder %v626_v40, %v628_v47  ;;  %vm552_vm12 = vcmp.eq.f32.partialorder %v549_v39, %v551_v48  ;;  %v634_v53 = vcvt.f32.s32 %v628_v47  ;;  %v557_v56 = vcvt.f32.s32 %v551_v48 }
 0x613   :  { %v630_v50 = vsel %vm629_vm11, %v625_v13, -inf  ;;  %v553_v51 = vsel %vm552_vm12, %v548_v49, -inf }
 0x614   :  { %631 = vmax.xlane.f32.xlu1 %v630_v50  ;;  %554 = vmax.xlane.f32.xlu0 %v553_v51  ;;  %v635_v59 = vshll.u32 %v634_v53, 16  ;;  %v558_v62 = vshll.u32 %v557_v56, 16 }
 0x69d   :  { %v477_v54 = vpop.xlane.xlu1 %476 }
 0x69e   :  { %v478_v57 = vcvt.f32.s32 %v477_v54 }
 0x6a0   :  { %v481_v58 = vadd.s32 %v480_v55, %v478_v57 }
 0x6a1   :  { %v555_v60 = vpop.xlane.xlu0 %554  ;;  %v632_v61 = vpop.xlane.xlu1 %631 }
 0x6a2   :  { %v482_v63 = vand.u32 127, %v481_v58  ;;  %v556_v0 = vcvt.f32.s32 %v555_v60  ;;  %v633_v1 = vcvt.f32.s32 %v632_v61 }
 0x6a4   :  { %v483_v2 = vsub.s32 127, %v482_v63  ;;  %v559_v3 = vadd.s32 %v558_v62, %v556_v0  ;;  %v636_v4 = vadd.s32 %v635_v59, %v633_v1 }
 0x6a6   :  { %485 = vst.msk [vmem:[%s974_s5] sm:$0xff] %vm484_vm13, %v483_v2  ;;  %v560_v5 = vand.u32 127, %v559_v3  ;;  %v637_v35 = vand.u32 127, %v636_v4 }
 0x6a8   :  { %v561_v6 = vsub.s32 127, %v560_v5  ;;  %v638_v7 = vsub.s32 127, %v637_v35 }
 0x6aa   :  { %652 = vst.msk [vmem:[%s974_s5 + $0x8] sm:$0xff] %vm484_vm13, %v561_v6  ;;  %656 = vst.msk [vmem:[%s974_s5 + $0x10] sm:$0xff] %vm484_vm13, %v638_v7 }
 0x6ab   :  { %644 = vsyncpa [#allocation3], 1 }
 0x6ac   :  { %645 = vsyncpa [#allocation5], 1 }

</bundles_post_ra>
